<compile_context>
chip_gen: v7x
topology: tpu7x:2x2x1
jax: 0.10.0
libtpu: 0.0.40
codegen_flags: <defaults>
</compile_context>

<pallas_src>
import jax
import jax.numpy as jnp
from jax.experimental import pallas as pl
from jax.experimental.pallas import tpu as pltpu

# --- "config" fields used by the torch module ---------------------------------
EMBED_DIM = 32      # config.embed_dim  (== width of concat([l2r, r2l], -1))
MLP_DIM = 32        # config.mlp_dim    (== temb feature width)
VOCAB_SIZE = 16     # config.vocab_size (readout_dim == 0 -> out_dim = vocab_size)
NUM_RES = 2         # config.num_output_ffresiduals
LN_EPS = 1e-5       # torch.nn.LayerNorm default eps


def _gelu(v):
    # TODO(synk): torch nn.GELU() default is the exact erf-GELU; the tanh
    # approximation is used (consistently in kernel + reference) to guarantee
    # EUP lowering.
    return jax.nn.gelu(v, approximate=True)


def _round_up(x, m):
    return -(-x // m) * m


# --- Pallas kernel: residual blocks + logits for one (batch, TILE_L) row tile --
def _readout_kernel(l2r_ref, r2l_ref, ag_ref, ab_ref,
                    wz1_ref, bz1_ref, wz2_ref, bz2_ref,   # z_layer MLP
                    wl_ref, bl_ref,                        # logits layer
                    out_ref):
    # x = torch.cat([l2r, r2l], dim=-1), built directly in VMEM.   (TILE_L, E)
    x = jnp.concatenate([l2r_ref[...], r2l_ref[...]], axis=-1)

    # Loop-invariant loads hoisted above the unrolled residual loop.
    ag = ag_ref[...]                   # (1, E)  a * gamma        (FiLM * LN scale)
    ab = ab_ref[...]                   # (1, E)  a * beta + b     (FiLM shift)
    wz1 = wz1_ref[...]; bz1 = bz1_ref[...]
    wz2 = wz2_ref[...]; bz2 = bz2_ref[...]

    # The torch module re-uses the same film/z/norm layers (and the same temb)
    # every iteration, so weights and FiLM params are shared across blocks.
    for _ in range(NUM_RES):
        # z = MLP([mlp_dim, embed_dim], GELU)(x)
        z = _gelu(jnp.dot(x, wz1, preferred_element_type=jnp.float32) + bz1)
        z = jnp.dot(z, wz2, preferred_element_type=jnp.float32) + bz2     # (TILE_L, E)

        # x = LayerNorm(x + z)  (biased variance, like torch), then FiLM,
        # with the LN affine folded into the FiLM scale/shift.
        h = x + z
        mu = jnp.mean(h, axis=-1, keepdims=True)
        var = jnp.mean((h - mu) ** 2, axis=-1, keepdims=True)
        hn = (h - mu) * jax.lax.rsqrt(var + LN_EPS)
        x = hn * ag + ab

    # logits = Linear(x); logical-width (V=16) store — no 128-lane padding and
    # no wrapper-side slice pass over the output.
    out_ref[...] = jnp.dot(x, wl_ref[...], preferred_element_type=jnp.float32) + bl_ref[...]


# --- wrapper -------------------------------------------------------------------
@jax.jit
def concat_residual_readout(l2r_embed, r2l_embed, temb, params):
    B, L, H = l2r_embed.shape
    E = 2 * H
    assert E == EMBED_DIM
    V = params["wl"].shape[-1]

    # ---- hoisted temb / FiLM path (loop-invariant, M=1 matmuls: leave to XLA) --
    t = _gelu(temb @ params["w1"] + params["b1"])
    t = t @ params["w2"] + params["b2"]                    # (B, 4E)
    film = t @ params["wf"] + params["bf"]                 # (B, 2E)
    a, b = film[:, :E], film[:, E:]
    # Fold the LayerNorm affine into FiLM:  a*(hn*g + bn) + b == hn*(a*g) + (a*bn + b)
    ag = (a * params["g"])[:, None, :]                     # (B, 1, E)
    ab = (a * params["bn"] + b)[:, None, :]                # (B, 1, E)

    # ---- per-batch row tiling ---------------------------------------------------
    TILE_L = min(512, _round_up(L, 8))                     # multiple of 8 sublanes
    L_pad = _round_up(L, TILE_L)
    if L_pad != L:
        pad = ((0, 0), (0, L_pad - L), (0, 0))
        l2r_embed = jnp.pad(l2r_embed, pad)
        r2l_embed = jnp.pad(r2l_embed, pad)

    grid = (B, L_pad // TILE_L)

    def const_spec(bshape):
        # weights/biases: same block every step -> stay resident, DMA'd once.
        return pl.BlockSpec(bshape, lambda bi, li: (0,) * len(bshape))

    out = pl.pallas_call(
        _readout_kernel,
        out_shape=jax.ShapeDtypeStruct((B, L_pad, V), jnp.float32),
        grid=grid,
        in_specs=[
            pl.BlockSpec((None, TILE_L, H), lambda bi, li: (bi, li, 0)),   # l2r
            pl.BlockSpec((None, TILE_L, H), lambda bi, li: (bi, li, 0)),   # r2l
            pl.BlockSpec((None, 1, E), lambda bi, li: (bi, 0, 0)),         # ag (per batch)
            pl.BlockSpec((None, 1, E), lambda bi, li: (bi, 0, 0)),         # ab (per batch)
            const_spec((E, E)),                                            # wz1
            const_spec((1, E)),                                            # bz1
            const_spec((E, E)),                                            # wz2
            const_spec((1, E)),                                            # bz2
            const_spec((E, V)),                                            # wl
            const_spec((1, V)),                                            # bl
        ],
        out_specs=pl.BlockSpec((None, TILE_L, V), lambda bi, li: (bi, li, 0)),
        compiler_params=pltpu.CompilerParams(
            dimension_semantics=("parallel", "parallel")),
        # TODO(synk): for more v7x headroom, cast l2r/r2l/ag/ab + weights to bf16
        # (keeping f32 matmul accumulation + f32 LayerNorm stats) and lane-pack
        # 4 rows per 128-lane group with block-diagonal wz1/wz2/wl; skipped here
        # to preserve the 1e-4 f32 parity check against the reference.
    )(l2r_embed, r2l_embed, ag, ab,
      params["wz1"], params["bz1"], params["wz2"], params["bz2"],
      params["wl"], params["bl"])

    if L_pad != L:
        out = out[:, :L]
    return out


# --- deterministic parameter init (shapes from __init__, dataflow-fixed in dims)
def init_params(key):
    E, T, V = EMBED_DIM, MLP_DIM, VOCAB_SIZE
    ks = jax.random.split(key, 12)

    def w(k, shape):
        return jax.random.normal(k, shape, jnp.float32) * 0.02

    return dict(
        # temb MLP: features = [mlp_dim, 4*embed_dim]
        w1=w(ks[0], (T, 4 * E)),       b1=w(ks[1], (1, 4 * E)),
        w2=w(ks[2], (4 * E, 4 * E)),   b2=w(ks[3], (1, 4 * E)),
        # film_params_layer: out = 2*embed_dim
        wf=w(ks[4], (4 * E, 2 * E)),   bf=w(ks[5], (1, 2 * E)),
        # z_layer MLP: features = [mlp_dim, embed_dim]
        wz1=w(ks[6], (E, E)),          bz1=w(ks[7], (1, E)),
        wz2=w(ks[8], (E, E)),          bz2=w(ks[9], (1, E)),
        # LayerNorm affine (torch default init: ones / zeros)
        g=jnp.ones((1, E), jnp.float32), bn=jnp.zeros((1, E), jnp.float32),
        # logits_layer: out = vocab_size
        wl=w(ks[10], (E, V)),          bl=w(ks[11], (1, V)),
    )


# --- pure-JAX reference (un-folded math, used as a silent sanity check) --------
def reference(l2r, r2l, temb, p):
    x = jnp.concatenate([l2r, r2l], axis=-1)
    t = _gelu(temb @ p["w1"] + p["b1"])
    t = t @ p["w2"] + p["b2"]
    for _ in range(NUM_RES):
        film = (t @ p["wf"] + p["bf"])[:, None, :]           # (B, 1, 2E)
        a, b = jnp.split(film, 2, axis=-1)
        z = _gelu(x @ p["wz1"] + p["bz1"]) @ p["wz2"] + p["bz2"]
        h = x + z
        mu = h.mean(-1, keepdims=True)
        var = ((h - mu) ** 2).mean(-1, keepdims=True)
        xn = (h - mu) * jax.lax.rsqrt(var + LN_EPS) * p["g"] + p["bn"]
        x = a * xn + b
    return x @ p["wl"] + p["bl"]


if __name__ == "__main__":
    key = jax.random.PRNGKey(0)
    k1, k2, k3, kp = jax.random.split(key, 4)
    B, L, H = 2, 8, EMBED_DIM // 2
    l2r = jax.random.normal(k1, (B, L, H), jnp.float32)
    r2l = jax.random.normal(k2, (B, L, H), jnp.float32)
    temb = jax.random.normal(k3, (B, MLP_DIM), jnp.float32)
    params = init_params(kp)

    out = jax.block_until_ready(concat_residual_readout(l2r, r2l, temb, params))

    ref = reference(l2r, r2l, temb, params)
    assert out.shape == (B, L, VOCAB_SIZE)
    assert bool(jnp.allclose(out, ref, atol=1e-4, rtol=1e-4)), "kernel/reference mismatch"
    print("KERNEL_OK")
</pallas_src>

<mosaic_0001>
module attributes {stable_mosaic.version = 11 : i64} {
  func.func @_readout_kernel(%arg0: i32, %arg1: i32, %arg2: memref<1x8x16xf32, #tpu.memory_space<vmem>>, %arg3: memref<1x8x16xf32, #tpu.memory_space<vmem>>, %arg4: memref<1x1x32xf32, #tpu.memory_space<vmem>>, %arg5: memref<1x1x32xf32, #tpu.memory_space<vmem>>, %arg6: memref<32x32xf32, #tpu.memory_space<vmem>>, %arg7: memref<1x32xf32, #tpu.memory_space<vmem>>, %arg8: memref<32x32xf32, #tpu.memory_space<vmem>>, %arg9: memref<1x32xf32, #tpu.memory_space<vmem>>, %arg10: memref<32x16xf32, #tpu.memory_space<vmem>>, %arg11: memref<1x16xf32, #tpu.memory_space<vmem>>, %arg12: memref<1x8x16xf32, #tpu.memory_space<vmem>>) attributes {dimension_semantics = [#tpu.dimension_semantics<parallel>, #tpu.dimension_semantics<parallel>], iteration_bounds = array<i64: 2, 1>, scalar_prefetch = 0 : i64, scratch_operands = 0 : i64, tpu.core_type = #tpu.core_type<tc>, window_params = [{transform_indices = @transform_0, window_bounds = array<i64: 1, 8, 16>}, {transform_indices = @transform_1, window_bounds = array<i64: 1, 8, 16>}, {transform_indices = @transform_2, window_bounds = array<i64: 1, 1, 32>}, {transform_indices = @transform_3, window_bounds = array<i64: 1, 1, 32>}, {pipeline_mode = #tpu.pipeline_mode<synchronous>, transform_indices = @transform_4, window_bounds = array<i64: 32, 32>}, {pipeline_mode = #tpu.pipeline_mode<synchronous>, transform_indices = @transform_5, window_bounds = array<i64: 1, 32>}, {pipeline_mode = #tpu.pipeline_mode<synchronous>, transform_indices = @transform_6, window_bounds = array<i64: 32, 32>}, {pipeline_mode = #tpu.pipeline_mode<synchronous>, transform_indices = @transform_7, window_bounds = array<i64: 1, 32>}, {pipeline_mode = #tpu.pipeline_mode<synchronous>, transform_indices = @transform_8, window_bounds = array<i64: 32, 16>}, {pipeline_mode = #tpu.pipeline_mode<synchronous>, transform_indices = @transform_9, window_bounds = array<i64: 1, 16>}, {transform_indices = @transform_10, window_bounds = array<i64: 1, 8, 16>}]} {
    %c0 = arith.constant 0 : index
    %c0_0 = arith.constant 0 : index
    %c0_1 = arith.constant 0 : index
    %0 = vector.load %arg2[%c0, %c0_0, %c0_1] : memref<1x8x16xf32, #tpu.memory_space<vmem>>, vector<1x8x16xf32>
    %1 = vector.shape_cast %0 : vector<1x8x16xf32> to vector<8x16xf32>
    %c0_2 = arith.constant 0 : index
    %c0_3 = arith.constant 0 : index
    %c0_4 = arith.constant 0 : index
    %2 = vector.load %arg3[%c0_2, %c0_3, %c0_4] : memref<1x8x16xf32, #tpu.memory_space<vmem>>, vector<1x8x16xf32>
    %3 = vector.shape_cast %2 : vector<1x8x16xf32> to vector<8x16xf32>
    %4 = tpu.concatenate %1, %3 in 1 : vector<8x16xf32>, vector<8x16xf32> -> vector<8x32xf32>
    %c0_5 = arith.constant 0 : index
    %c0_6 = arith.constant 0 : index
    %c0_7 = arith.constant 0 : index
    %5 = vector.load %arg4[%c0_5, %c0_6, %c0_7] : memref<1x1x32xf32, #tpu.memory_space<vmem>>, vector<1x1x32xf32>
    %6 = vector.shape_cast %5 : vector<1x1x32xf32> to vector<1x32xf32>
    %c0_8 = arith.constant 0 : index
    %c0_9 = arith.constant 0 : index
    %c0_10 = arith.constant 0 : index
    %7 = vector.load %arg5[%c0_8, %c0_9, %c0_10] : memref<1x1x32xf32, #tpu.memory_space<vmem>>, vector<1x1x32xf32>
    %8 = vector.shape_cast %7 : vector<1x1x32xf32> to vector<1x32xf32>
    %c0_11 = arith.constant 0 : index
    %c0_12 = arith.constant 0 : index
    %9 = vector.load %arg6[%c0_11, %c0_12] : memref<32x32xf32, #tpu.memory_space<vmem>>, vector<32x32xf32>
    %c0_13 = arith.constant 0 : index
    %c0_14 = arith.constant 0 : index
    %10 = vector.load %arg7[%c0_13, %c0_14] : memref<1x32xf32, #tpu.memory_space<vmem>>, vector<1x32xf32>
    %c0_15 = arith.constant 0 : index
    %c0_16 = arith.constant 0 : index
    %11 = vector.load %arg8[%c0_15, %c0_16] : memref<32x32xf32, #tpu.memory_space<vmem>>, vector<32x32xf32>
    %c0_17 = arith.constant 0 : index
    %c0_18 = arith.constant 0 : index
    %12 = vector.load %arg9[%c0_17, %c0_18] : memref<1x32xf32, #tpu.memory_space<vmem>>, vector<1x32xf32>
    %cst = arith.constant dense<0.000000e+00> : vector<8x32xf32>
    %13 = tpu.matmul %4, %9, %cst {dimension_numbers = #tpu.dot_dimension_numbers<[1], [0], [0], [1], [0, 0, 1, 1], [], []>} : vector<8x32xf32>, vector<32x32xf32>, vector<8x32xf32> -> vector<8x32xf32>
    %14 = vector.broadcast %10 : vector<1x32xf32> to vector<8x32xf32>
    %15 = arith.addf %13, %14 : vector<8x32xf32>
    %16 = arith.mulf %15, %15 : vector<8x32xf32>
    %17 = arith.mulf %15, %16 : vector<8x32xf32>
    %cst_19 = arith.constant 4.471500e-02 : f32
    %18 = vector.broadcast %cst_19 : f32 to vector<8x32xf32>
    %19 = arith.mulf %18, %17 : vector<8x32xf32>
    %20 = arith.addf %15, %19 : vector<8x32xf32>
    %cst_20 = arith.constant 0.797884583 : f32
    %21 = vector.broadcast %cst_20 : f32 to vector<8x32xf32>
    %22 = arith.mulf %21, %20 : vector<8x32xf32>
    %23 = math.tanh %22 : vector<8x32xf32>
    %cst_21 = arith.constant 1.000000e+00 : f32
    %24 = vector.broadcast %cst_21 : f32 to vector<8x32xf32>
    %25 = arith.addf %24, %23 : vector<8x32xf32>
    %cst_22 = arith.constant 5.000000e-01 : f32
    %26 = vector.broadcast %cst_22 : f32 to vector<8x32xf32>
    %27 = arith.mulf %26, %25 : vector<8x32xf32>
    %28 = arith.mulf %15, %27 : vector<8x32xf32>
    %cst_23 = arith.constant dense<0.000000e+00> : vector<8x32xf32>
    %29 = tpu.matmul %28, %11, %cst_23 {dimension_numbers = #tpu.dot_dimension_numbers<[1], [0], [0], [1], [0, 0, 1, 1], [], []>} : vector<8x32xf32>, vector<32x32xf32>, vector<8x32xf32> -> vector<8x32xf32>
    %30 = vector.broadcast %12 : vector<1x32xf32> to vector<8x32xf32>
    %31 = arith.addf %29, %30 : vector<8x32xf32>
    %32 = arith.addf %4, %31 : vector<8x32xf32>
    %cst_24 = arith.constant dense<0.000000e+00> : vector<8xf32>
    %33 = vector.multi_reduction <add>, %32, %cst_24 [1] : vector<8x32xf32> to vector<8xf32>
    %34 = vector.shape_cast %33 : vector<8xf32> to vector<8x1xf32>
    %cst_25 = arith.constant 3.200000e+01 : f32
    %35 = vector.broadcast %cst_25 : f32 to vector<8x1xf32>
    %36 = arith.divf %34, %35 : vector<8x1xf32>
    %37 = vector.broadcast %36 : vector<8x1xf32> to vector<8x32xf32>
    %38 = arith.subf %32, %37 : vector<8x32xf32>
    %39 = arith.mulf %38, %38 : vector<8x32xf32>
    %cst_26 = arith.constant dense<0.000000e+00> : vector<8xf32>
    %40 = vector.multi_reduction <add>, %39, %cst_26 [1] : vector<8x32xf32> to vector<8xf32>
    %41 = vector.shape_cast %40 : vector<8xf32> to vector<8x1xf32>
    %cst_27 = arith.constant 3.200000e+01 : f32
    %42 = vector.broadcast %cst_27 : f32 to vector<8x1xf32>
    %43 = arith.divf %41, %42 : vector<8x1xf32>
    %44 = vector.broadcast %36 : vector<8x1xf32> to vector<8x32xf32>
    %45 = arith.subf %32, %44 : vector<8x32xf32>
    %cst_28 = arith.constant 9.99999974E-6 : f32
    %46 = vector.broadcast %cst_28 : f32 to vector<8x1xf32>
    %47 = arith.addf %43, %46 : vector<8x1xf32>
    %48 = math.rsqrt %47 : vector<8x1xf32>
    %49 = vector.broadcast %48 : vector<8x1xf32> to vector<8x32xf32>
    %50 = arith.mulf %45, %49 : vector<8x32xf32>
    %51 = vector.broadcast %6 : vector<1x32xf32> to vector<8x32xf32>
    %52 = arith.mulf %50, %51 : vector<8x32xf32>
    %53 = vector.broadcast %8 : vector<1x32xf32> to vector<8x32xf32>
    %54 = arith.addf %52, %53 : vector<8x32xf32>
    %cst_29 = arith.constant dense<0.000000e+00> : vector<8x32xf32>
    %55 = tpu.matmul %54, %9, %cst_29 {dimension_numbers = #tpu.dot_dimension_numbers<[1], [0], [0], [1], [0, 0, 1, 1], [], []>} : vector<8x32xf32>, vector<32x32xf32>, vector<8x32xf32> -> vector<8x32xf32>
    %56 = vector.broadcast %10 : vector<1x32xf32> to vector<8x32xf32>
    %57 = arith.addf %55, %56 : vector<8x32xf32>
    %58 = arith.mulf %57, %57 : vector<8x32xf32>
    %59 = arith.mulf %57, %58 : vector<8x32xf32>
    %cst_30 = arith.constant 4.471500e-02 : f32
    %60 = vector.broadcast %cst_30 : f32 to vector<8x32xf32>
    %61 = arith.mulf %60, %59 : vector<8x32xf32>
    %62 = arith.addf %57, %61 : vector<8x32xf32>
    %cst_31 = arith.constant 0.797884583 : f32
    %63 = vector.broadcast %cst_31 : f32 to vector<8x32xf32>
    %64 = arith.mulf %63, %62 : vector<8x32xf32>
    %65 = math.tanh %64 : vector<8x32xf32>
    %cst_32 = arith.constant 1.000000e+00 : f32
    %66 = vector.broadcast %cst_32 : f32 to vector<8x32xf32>
    %67 = arith.addf %66, %65 : vector<8x32xf32>
    %cst_33 = arith.constant 5.000000e-01 : f32
    %68 = vector.broadcast %cst_33 : f32 to vector<8x32xf32>
    %69 = arith.mulf %68, %67 : vector<8x32xf32>
    %70 = arith.mulf %57, %69 : vector<8x32xf32>
    %cst_34 = arith.constant dense<0.000000e+00> : vector<8x32xf32>
    %71 = tpu.matmul %70, %11, %cst_34 {dimension_numbers = #tpu.dot_dimension_numbers<[1], [0], [0], [1], [0, 0, 1, 1], [], []>} : vector<8x32xf32>, vector<32x32xf32>, vector<8x32xf32> -> vector<8x32xf32>
    %72 = vector.broadcast %12 : vector<1x32xf32> to vector<8x32xf32>
    %73 = arith.addf %71, %72 : vector<8x32xf32>
    %74 = arith.addf %54, %73 : vector<8x32xf32>
    %cst_35 = arith.constant dense<0.000000e+00> : vector<8xf32>
    %75 = vector.multi_reduction <add>, %74, %cst_35 [1] : vector<8x32xf32> to vector<8xf32>
    %76 = vector.shape_cast %75 : vector<8xf32> to vector<8x1xf32>
    %cst_36 = arith.constant 3.200000e+01 : f32
    %77 = vector.broadcast %cst_36 : f32 to vector<8x1xf32>
    %78 = arith.divf %76, %77 : vector<8x1xf32>
    %79 = vector.broadcast %78 : vector<8x1xf32> to vector<8x32xf32>
    %80 = arith.subf %74, %79 : vector<8x32xf32>
    %81 = arith.mulf %80, %80 : vector<8x32xf32>
    %cst_37 = arith.constant dense<0.000000e+00> : vector<8xf32>
    %82 = vector.multi_reduction <add>, %81, %cst_37 [1] : vector<8x32xf32> to vector<8xf32>
    %83 = vector.shape_cast %82 : vector<8xf32> to vector<8x1xf32>
    %cst_38 = arith.constant 3.200000e+01 : f32
    %84 = vector.broadcast %cst_38 : f32 to vector<8x1xf32>
    %85 = arith.divf %83, %84 : vector<8x1xf32>
    %86 = vector.broadcast %78 : vector<8x1xf32> to vector<8x32xf32>
    %87 = arith.subf %74, %86 : vector<8x32xf32>
    %cst_39 = arith.constant 9.99999974E-6 : f32
    %88 = vector.broadcast %cst_39 : f32 to vector<8x1xf32>
    %89 = arith.addf %85, %88 : vector<8x1xf32>
    %90 = math.rsqrt %89 : vector<8x1xf32>
    %91 = vector.broadcast %90 : vector<8x1xf32> to vector<8x32xf32>
    %92 = arith.mulf %87, %91 : vector<8x32xf32>
    %93 = vector.broadcast %6 : vector<1x32xf32> to vector<8x32xf32>
    %94 = arith.mulf %92, %93 : vector<8x32xf32>
    %95 = vector.broadcast %8 : vector<1x32xf32> to vector<8x32xf32>
    %96 = arith.addf %94, %95 : vector<8x32xf32>
    %c0_40 = arith.constant 0 : index
    %c0_41 = arith.constant 0 : index
    %97 = vector.load %arg10[%c0_40, %c0_41] : memref<32x16xf32, #tpu.memory_space<vmem>>, vector<32x16xf32>
    %cst_42 = arith.constant dense<0.000000e+00> : vector<8x16xf32>
    %98 = tpu.matmul %96, %97, %cst_42 {dimension_numbers = #tpu.dot_dimension_numbers<[1], [0], [0], [1], [0, 0, 1, 1], [], []>} : vector<8x32xf32>, vector<32x16xf32>, vector<8x16xf32> -> vector<8x16xf32>
    %c0_43 = arith.constant 0 : index
    %c0_44 = arith.constant 0 : index
    %99 = vector.load %arg11[%c0_43, %c0_44] : memref<1x16xf32, #tpu.memory_space<vmem>>, vector<1x16xf32>
    %100 = vector.broadcast %99 : vector<1x16xf32> to vector<8x16xf32>
    %101 = arith.addf %98, %100 : vector<8x16xf32>
    %c0_45 = arith.constant 0 : index
    %c0_46 = arith.constant 0 : index
    %c0_47 = arith.constant 0 : index
    %102 = vector.load %arg12[%c0_45, %c0_46, %c0_47] : memref<1x8x16xf32, #tpu.memory_space<vmem>>, vector<1x8x16xf32>
    %103 = vector.shape_cast %102 : vector<1x8x16xf32> to vector<8x16xf32>
    %104 = vector.shape_cast %101 : vector<8x16xf32> to vector<1x8x16xf32>
    tpu.vector_store %arg12[%c0_45, %c0_46, %c0_47], %104 {strides = array<i32>} : memref<1x8x16xf32, #tpu.memory_space<vmem>>, vector<1x8x16xf32>,
    return
  }
  func.func @transform_0(%arg0: i32, %arg1: i32) -> (i32, i32, i32) {
    %c0_i32 = arith.constant 0 : i32
    %c0_i32_0 = arith.constant 0 : i32
    return %arg0, %arg1, %c0_i32 : i32, i32, i32
  }
  func.func @transform_1(%arg0: i32, %arg1: i32) -> (i32, i32, i32) {
    %c0_i32 = arith.constant 0 : i32
    %c0_i32_0 = arith.constant 0 : i32
    return %arg0, %arg1, %c0_i32 : i32, i32, i32
  }
  func.func @transform_2(%arg0: i32, %arg1: i32) -> (i32, i32, i32) {
    %c0_i32 = arith.constant 0 : i32
    %c0_i32_0 = arith.constant 0 : i32
    %c0_i32_1 = arith.constant 0 : i32
    return %arg0, %c0_i32, %c0_i32_0 : i32, i32, i32
  }
  func.func @transform_3(%arg0: i32, %arg1: i32) -> (i32, i32, i32) {
    %c0_i32 = arith.constant 0 : i32
    %c0_i32_0 = arith.constant 0 : i32
    %c0_i32_1 = arith.constant 0 : i32
    return %arg0, %c0_i32, %c0_i32_0 : i32, i32, i32
  }
  func.func @transform_4(%arg0: i32, %arg1: i32) -> (i32, i32) {
    %c0_i32 = arith.constant 0 : i32
    %c0_i32_0 = arith.constant 0 : i32
    %c0_i32_1 = arith.constant 0 : i32
    return %c0_i32, %c0_i32_0 : i32, i32
  }
  func.func @transform_5(%arg0: i32, %arg1: i32) -> (i32, i32) {
    %c0_i32 = arith.constant 0 : i32
    %c0_i32_0 = arith.constant 0 : i32
    %c0_i32_1 = arith.constant 0 : i32
    return %c0_i32, %c0_i32_0 : i32, i32
  }
  func.func @transform_6(%arg0: i32, %arg1: i32) -> (i32, i32) {
    %c0_i32 = arith.constant 0 : i32
    %c0_i32_0 = arith.constant 0 : i32
    %c0_i32_1 = arith.constant 0 : i32
    return %c0_i32, %c0_i32_0 : i32, i32
  }
  func.func @transform_7(%arg0: i32, %arg1: i32) -> (i32, i32) {
    %c0_i32 = arith.constant 0 : i32
    %c0_i32_0 = arith.constant 0 : i32
    %c0_i32_1 = arith.constant 0 : i32
    return %c0_i32, %c0_i32_0 : i32, i32
  }
  func.func @transform_8(%arg0: i32, %arg1: i32) -> (i32, i32) {
    %c0_i32 = arith.constant 0 : i32
    %c0_i32_0 = arith.constant 0 : i32
    %c0_i32_1 = arith.constant 0 : i32
    return %c0_i32, %c0_i32_0 : i32, i32
  }
  func.func @transform_9(%arg0: i32, %arg1: i32) -> (i32, i32) {
    %c0_i32 = arith.constant 0 : i32
    %c0_i32_0 = arith.constant 0 : i32
    %c0_i32_1 = arith.constant 0 : i32
    return %c0_i32, %c0_i32_0 : i32, i32
  }
  func.func @transform_10(%arg0: i32, %arg1: i32) -> (i32, i32, i32) {
    %c0_i32 = arith.constant 0 : i32
    %c0_i32_0 = arith.constant 0 : i32
    return %arg0, %arg1, %c0_i32 : i32, i32, i32
  }
}

</mosaic_0001>

<bundles_post_ra>
// kernel: concat_residual_readout.1
= control target key start
LH: loop header
LB: loop body
LE: loop exit
PB: predicated region body
PF: predicated region fallthrough
CT: control target
= control target key end

     0   :  { %s1569_s0 = inlined_call_operand.vmem [shape: f32[2,8,16], index: 0, kind: input, shape index: {}]   ;;  %s1570_s1 = inlined_call_operand.vmem [shape: f32[2,8,16], index: 1, kind: input, shape index: {}]   ;;  %s1571_s2 = inlined_call_operand.vmem [shape: f32[2,1,32], index: 2, kind: input, shape index: {}]   ;;  %s1572_s3 = inlined_call_operand.vmem [shape: f32[2,1,32], index: 3, kind: input, shape index: {}]   ;;  %s1573_s4 = inlined_call_operand.vmem [shape: f32[32,32], index: 4, kind: input, shape index: {}]   ;;  %s1574_s5 = inlined_call_operand.vmem [shape: f32[1,32], index: 5, kind: input, shape index: {}]   ;;  %s1575_s6 = inlined_call_operand.vmem [shape: f32[32,32], index: 6, kind: input, shape index: {}]   ;;  %s1576_s7 = inlined_call_operand.vmem [shape: f32[1,32], index: 7, kind: input, shape index: {}]   ;;  %s1577_s8 = inlined_call_operand.vmem [shape: f32[32,16], index: 8, kind: input, shape index: {}]   ;;  %s1578_s9 = inlined_call_operand.vmem [shape: f32[1,16], index: 9, kind: input, shape index: {}]   ;;  %s1579_s10 = inlined_call_operand.hbm [shape: f32[2,8,16], index: 10, kind: output, shape index: {}]  }
   0x1   :  { %1580 = sst [smem:[#allocation5_spill]] %s1569_s0 }
   0x2   :  { %15 = vsyncpa [#allocation3], 0 }
   0x3   :  { %17 = vsyncpa [#allocation3 + $0x1], 0  ;;  %s1367_s13 = smov 0   ;;  %s1369_s14 = smov 0  }
   0x4   :  { %s1371_s15 = smov 0   ;;  %s1373_s16 = smov 0  }
   0x5   :  { %s1375_s17 = smov 0   ;;  %s1377_s18 = smov 0  }
   0x6 LB: > { %s1028_s19 = sadd.s32 4294967295, %s1305_s18   ;;  %s1029_s20 = sadd.s32 4294967294, %s1305_s18   ;;  %s1305_s18 = sphi %s1377_s18, %s23_s18   ;;  %s1301_s17 = sphi %s1375_s17, %s1588_s17   ;;  %s1297_s16 = sphi %s1373_s16, %s1587_s16   ;;  %s1293_s15 = sphi %s1371_s15, %s1586_s15   ;;  %s1289_s14 = sphi %s1369_s14, %s1585_s14   ;;  %s1285_s13 = sphi %s1367_s13, %s1584_s13  }
   0x7   : > { %s35_s21 = sadd.s32 1, %s1301_s17  ;;  %s278_s22 = sadd.s32 1, %s1293_s15 }
   0x8   : > { %p37_p0 = scmp.ge.s32.totalorder %s35_s21, 2  ;;  %p288_p1 = scmp.ne.s32.totalorder %s1293_s15, %s1289_s14 }
   0x9   : > { %p289_p2 = scmp.eq.s32.totalorder %s1028_s19, 1  ;;  %p294_p3 = scmp.ne.s32.totalorder %s1289_s14, %s1285_s13 }
   0xa   : > { %s1590_s21 = smov (%p37_p0, %s35_s21), 0  ;;  %p295_p5 = scmp.eq.s32.totalorder %s1029_s20, 1 }
   0xb   : > { %p1407_p4 = por %p289_p2, %p288_p1  ;;  %s273_s24 = ssub.s32 %s1301_s17, %s1590_s21 }
   0xc   : > { %p1032_p6 = scmp.ge.s32.totalorder %s1305_s18, 1  ;;  %p276_p7 = scmp.eq.s32.totalorder %s273_s24, 0 }
   0xd   : > { %p1414_p8 = por %p295_p5, %p294_p3  ;;  %p363_p9 = scmp.lt.s32.totalorder %s1305_s18, 3 }
   0xe   : > { %s1420_s26 = scalar_select %p276_p7, %s1293_s15, %s278_s22  }
   0xf   : > { %p364_p10 = pnand %p1032_p6, %p363_p9 }
  0x10   : > { %p416_p11 = scmp.lt.s32.totalorder (!%p364_p10), %s1297_s16, 1  ;;  %v446_v0 = vld [vmem:[%s1573_s4] sm:$0xff] (!%p364_p10)  ;;  %v447_v1 = vld [vmem:[%s1573_s4 + $0x8] sm:$0xff] (!%p364_p10)  ;;  %v448_v2 = vld [vmem:[%s1573_s4 + $0x10] sm:$0xff] (!%p364_p10)  ;;  %v1307_v3 = vmov (!%p364_p10), 0.0|0.0   ;;  %vm1308_vm0 = vmmov (!%p364_p10), 0  }
  0x11   : > { %367 = sbr.rel (%p364_p10) target bundleno = 1913 (0x779), region = 60  ;;  %1130 = vmatprep.subr.bf16.mxu0 (!%p364_p10), %v1307_v3  ;;  %v1131_v4 = vpack.c.bf16 (!%p364_p10), %v447_v1, %v446_v0  ;;  %v449_v5 = vld [vmem:[%s1573_s4 + $0x18] sm:$0xff] (!%p364_p10)  ;;  %1136 = vmatprep.subr.bf16.mxu1 (!%p364_p10), %v1307_v3  ;;  %v1309_v6 = vmov (!%p364_p10), 0.0   ;;  %s1310_s30 = smov (!%p364_p10), 16   ;;  %vm442_vm1 = vcmask (!%p364_p10), 130048   ;;  %vm462_vm2 = vcmask (!%p364_p10), 261120  }
  0x12   : > { %1083 = vmatprep.mubr.msk.f32.mxu0 (!%p364_p10), %vm1308_vm0, %v1309_v6  ;;  %1094 = vmatprep.mubr.msk.f32.mxu1 (!%p364_p10), %vm1308_vm0, %v1309_v6  ;;  %v1134_v7 = vpack.c.bf16 (!%p364_p10), %v449_v5, %v448_v2  ;;  %s1583_s0 = sld [smem:[#allocation5_spill]] (!%p364_p10)  ;;  %v451_v12 = vld [vmem:[%s1575_s6] sm:$0xff] (!%p364_p10)  ;;  %v452_v13 = vld [vmem:[%s1575_s6 + $0x8] sm:$0xff] (!%p364_p10)  ;;  %v453_v14 = vld [vmem:[%s1575_s6 + $0x10] sm:$0xff] (!%p364_p10)  ;;  %s413_s12 = sand.u32 (!%p364_p10), 1, %s1289_s14  }
  0x13   : > { %1132 = vmatpush3.bf16.msra.mxu0 (!%p364_p10), %v1131_v4  ;;  %v1137_v15 = vpack.c.bf16 (!%p364_p10), %v452_v13, %v451_v12  ;;  %v454_v16 = vld [vmem:[%s1575_s6 + $0x18] sm:$0xff] (!%p364_p10)  ;;  %v1036_v18 = vld [vmem:[%s1574_s5] ss:$0 sm:$0xff] (!%p364_p10)  ;;  %v826_v13 = vld [vmem:[%s1577_s8 + $0x10] sm:$0xff] (!%p364_p10)  ;;  %s1047_s27 = sshll.u32 (!%p364_p10), %s1297_s16, 7 }
  0x14   : > { %1133 = vmatprep.subr.bf16.mxu0 (!%p364_p10), %v1307_v3  ;;  %v1140_v17 = vpack.c.bf16 (!%p364_p10), %v454_v16, %v453_v14  ;;  %v1038_v31 = vld [vmem:[%s1576_s7] ss:$0 sm:$0xff] (!%p364_p10)  ;;  %v827_v14 = vld [vmem:[%s1577_s8 + $0x18] sm:$0xff] (!%p364_p10)  ;;  %s1521_s11 = scalar_lea.hbm (!%p364_p10), %s1579_s10, %s1047_s27 }
  0x15   : > { %1138 = vmatpush3.bf16.msra.mxu1 (!%p364_p10), %v1137_v15 }
  0x16   : > { %1139 = vmatprep.subr.bf16.mxu1 (!%p364_p10), %v1307_v3 }
  0x17   : > { %1135 = vmatpush3.bf16.msra.mxu0 (!%p364_p10), %v1134_v7 }
  0x18   : > { %s1438_s22 = scalar_select %p416_p11, %s1297_s16, 1  ;;  %1142 = vmatprep.subr.bf16.mxu0 %v1307_v3 }
  0x19   : > { %1141 = vmatpush3.bf16.msra.mxu1 %v1140_v17  ;;  %s1311_s16 = smov [#allocation2]  }
  0x1a   : > { %s1034_s24 = sshll.u32 %s1438_s22, 3  ;;  %1148 = vmatprep.subr.bf16.mxu1 %v1307_v3 }
  0x1b   : > { %s429_s29 = scalar_lea.vmem %s1570_s1, %s1034_s24  ;;  %s422_s19 = scalar_lea.vmem %s1583_s0, %s1034_s24 }
  0x1c   : > { %v437_v8 = vld [vmem:[%s429_s29] sm:$0xff] }
  0x1d   : > { %439 = vrot.lane.b32.xlu0 %v437_v8, %s1310_s30  ;;  %v436_v9 = vld [vmem:[%s422_s19] sm:$0xff]  ;;  %s432_s30 = scalar_lea.vmem %s1571_s2, %s1438_s22  ;;  %s435_s19 = scalar_lea.vmem %s1572_s3, %s1438_s22 }
  0x1e   : > { %v1040_v46 = vld [vmem:[%s432_s30] ss:$0 sm:$0xff]  ;;  %s910_s22 = scalar_lea.sflag [#allocation3], %s413_s12 }
  0x1f   : > { %v1041_v48 = vld [vmem:[%s435_s19] ss:$0 sm:$0xff]  ;;  %s1033_s19 = sshll.u32 %s413_s12, 3 }
  0x20   : > { %s415_s24 = scalar_lea.vmem [#allocation2], %s1033_s19  ;;  %s1231_s19 = sshll.u32 %s1311_s16, 4  ;;  %s1232_s19 = int_to_ptr.vmem [resolvable:$false] %s1231_s19 }
  0x21   : > { %s924_s28 = sshll.u32 %s415_s24, 4  ;;  %s1233_s0 = scalar_lea.vmem %s1232_s19, 256  ;;  %s1523_s28 = int_to_ptr.vmem [resolvable:$true] %s924_s28 }
  0x22   : > { %s1227_s20 = scalar_lea.vmem %s1523_s28, 128  ;;  %p1234_p1 = scmp.lt.s32.totalorder %s1523_s28, %s1232_s19 }
  0x23   : > { %p1228_p12 = scmp.ne.s32.totalorder %s1523_s28, %s1227_s20  ;;  %p1235_p2 = scmp.lt.s32.totalorder %s1233_s0, %s1227_s20 }
  0x25   : > { %p1229_p13 = pnand %p1228_p12, %p1407_p4  ;;  %p1236_p3 = por %p1235_p2, %p1234_p1 }
  0x27   : > { %p1230_p0 = pneg %p1229_p13 }
  0x29   : > { %p1237_p5 = pnand %p1236_p3, %p1230_p0 }
  0x8f   : > { %v440_v10 = vpop.permute.xlu0 %439 }
  0x90   : > { %v443_v11 = vsel %vm442_vm1, %v436_v9, %v440_v10  ;;  %v824_v10 = vld [vmem:[%s1577_s8] sm:$0xff] }
  0x91   : > { %1084 = vmatmul.mubr.msk.f32.vlgmr.msra.gmra.mrb[0].mxu0 %vm462_vm2, %v443_v11 }
  0x92   : > { %1144 = vmatpush3.bf16.msra.mxu0 %v1131_v4  ;;  %1105 = vmatprep.mubr.msk.f32.mxu0 %vm1308_vm0, %v1309_v6 }
  0x93   : > { %1145 = vmatprep.subr.bf16.mxu0 %v1307_v3 }
  0x96   : > { %1147 = vmatpush3.bf16.msra.mxu0 %v1134_v7 }
  0x97   : > { %1154 = vmatprep.subr.bf16.mxu0 %v1307_v3 }
 0x164   : > { %v532_v19 = vpop.f32.mrb[0].mxu0 }
 0x165   : > { %v533_v20 = vadd.f32 %v1036_v18, %v532_v19  ;;  %v1085_v21 = vpop.f32.mrb[1].mxu0 }
 0x167   : > { %v536_v22 = vmul.f32 %v533_v20, %v533_v20 }
 0x169   : > { %v537_v23 = vmul.f32 %v536_v22, %v533_v20 }
 0x16b   : > { %v538_v24 = vmul.f32 0.044715, %v537_v23 }
 0x16d   : > { %v539_v25 = vadd.f32 %v538_v24, %v533_v20 }
 0x16f   : > { %v540_v26 = vmul.f32 0.7978846, %v539_v25 }
 0x171   : > { %1219 = vtanh.f32 %v540_v26 }
 0x17b   : > { %v1220_v27 = vpop.eup %1219 }
 0x17c   : > { %v542_v28 = vadd.f32 1.0, %v1220_v27 }
 0x17e   : > { %v543_v29 = vmul.f32 0.5, %v542_v28 }
 0x180   : > { %v544_v30 = vmul.f32 %v543_v29, %v533_v20 }
 0x182   : > { %1095 = vmatmul.mubr.msk.f32.vlgmr.msra.gmra.mrb[0].mxu1 %vm462_vm2, %v544_v30 }
 0x183   : > { %1150 = vmatpush3.bf16.msra.mxu1 %v1137_v15  ;;  %1116 = vmatprep.mubr.msk.f32.mxu1 %vm1308_vm0, %v1309_v6  ;;  %v1158_v15 = vpack.c.bf16 %v827_v14, %v826_v13 }
 0x184   : > { %1151 = vmatprep.subr.bf16.mxu1 %v1307_v3 }
 0x187   : > { %1153 = vmatpush3.bf16.msra.mxu1 %v1140_v17 }
 0x255   : > { %v620_v32 = vpop.f32.mrb[0].mxu1 }
 0x256   : > { %v621_v33 = vadd.f32 %v1038_v31, %v620_v32  ;;  %v1096_v34 = vpop.f32.mrb[1].mxu1 }
 0x258   : > { %v624_v35 = vadd.f32 %v621_v33, %v443_v11  ;;  %v825_v11 = vld [vmem:[%s1577_s8 + $0x8] sm:$0xff] }
 0x259   : > { %v1155_v12 = vpack.c.bf16 %v825_v11, %v824_v10 }
 0x25a   : > { %v625_v36 = vsel %vm462_vm2, %v624_v35, 0.0 }
 0x25b   : > { %626 = vadd.xlane.f32.xlu0 %v625_v36 }
 0x2e8   : > { %v627_v37 = vpop.xlane.xlu0 %626 }
 0x2e9   : > { %v629_v38 = vmul.f32 0.03125, %v627_v37 }
 0x2eb   : > { %v630_v39 = vsub.f32 %v624_v35, %v629_v38 }
 0x2ed   : > { %v631_v40 = vmul.f32 %v630_v39, %v630_v39 }
 0x2ef   : > { %v632_v41 = vsel %vm462_vm2, %v631_v40, 0.0 }
 0x2f0   : > { %633 = vadd.xlane.f32.xlu1 %v632_v41 }
 0x37d   : > { %v634_v42 = vpop.xlane.xlu1 %633 }
 0x37e   : > { %v635_v43 = vmul.f32 0.03125, %v634_v42 }
 0x380   : > { %v636_v44 = vadd.f32 1e-05, %v635_v43 }
 0x382   : > { %1221 = vrsqrt.f32 %v636_v44 }
 0x38c   : > { %v1222_v45 = vpop.eup %1221 }
 0x38d   : > { %v638_v47 = vmul.f32 %v1222_v45, %v630_v39 }
 0x38f   : > { %v645_v49 = vmul.f32 %v1040_v46, %v638_v47 }
 0x391   : > { %v652_v50 = vadd.f32 %v1041_v48, %v645_v49 }
 0x393   : > { %1106 = vmatmul.mubr.msk.f32.vlgmr.msra.gmra.mrb[2].mxu0 %vm462_vm2, %v652_v50 }
 0x394   : > { %1127 = vmatprep.mubr.msk.f32.mxu0 %vm1308_vm0, %v1309_v6  ;;  %1156 = vmatpush3.bf16.msra.mxu0 %v1155_v12 }
 0x395   : > { %1157 = vmatprep.subr.bf16.mxu0 %v1307_v3  ;;  %v1044_v3 = vld [vmem:[%s1578_s9] ss:$0 sm:$0xff] }
 0x398   : > { %1159 = vmatpush3.bf16.msra.mxu0 %v1158_v15 }
 0x466   : > { %v722_v51 = vpop.f32.mrb[2].mxu0 }
 0x467   : > { %v723_v52 = vadd.f32 %v1036_v18, %v722_v51  ;;  %v1107_v53 = vpop.f32.mrb[3].mxu0 }
 0x469   : > { %v726_v54 = vmul.f32 %v723_v52, %v723_v52 }
 0x46b   : > { %v727_v55 = vmul.f32 %v726_v54, %v723_v52 }
 0x46d   : > { %v728_v56 = vmul.f32 0.044715, %v727_v55 }
 0x46f   : > { %v729_v57 = vadd.f32 %v728_v56, %v723_v52 }
 0x471   : > { %v730_v58 = vmul.f32 0.7978846, %v729_v57 }
 0x473   : > { %1223 = vtanh.f32 %v730_v58 }
 0x47d   : > { %v1224_v59 = vpop.eup %1223 }
 0x47e   : > { %v732_v60 = vadd.f32 1.0, %v1224_v59 }
 0x480   : > { %v733_v61 = vmul.f32 0.5, %v732_v60 }
 0x482   : > { %v734_v62 = vmul.f32 %v733_v61, %v723_v52 }
 0x484   : > { %1117 = vmatmul.mubr.msk.f32.vlgmr.msra.gmra.mrb[2].mxu1 %vm462_vm2, %v734_v62 }
 0x557   : > { %v804_v63 = vpop.f32.mrb[2].mxu1 }
 0x558   : > { %v805_v0 = vadd.f32 %v1038_v31, %v804_v63  ;;  %v1118_v1 = vpop.f32.mrb[3].mxu1 }
 0x55a   : > { %v808_v2 = vadd.f32 %v805_v0, %v652_v50 }
 0x55c   : > { %v809_v4 = vsel %vm462_vm2, %v808_v2, 0.0 }
 0x55d   : > { %810 = vadd.xlane.f32.xlu1 %v809_v4 }
 0x5ea   : > { %v811_v5 = vpop.xlane.xlu1 %810 }
 0x5eb   : > { %v812_v6 = vmul.f32 0.03125, %v811_v5 }
 0x5ed   : > { %v813_v7 = vsub.f32 %v808_v2, %v812_v6 }
 0x5ef   : > { %v814_v8 = vmul.f32 %v813_v7, %v813_v7 }
 0x5f1   : > { %v815_v9 = vsel %vm462_vm2, %v814_v8, 0.0 }
 0x5f2   : > { %816 = vadd.xlane.f32.xlu1 %v815_v9 }
 0x67f   : > { %v817_v16 = vpop.xlane.xlu1 %816 }
 0x680   : > { %v818_v17 = vmul.f32 0.03125, %v817_v16 }
 0x682   : > { %v819_v18 = vadd.f32 1e-05, %v818_v17 }
 0x684   : > { %1225 = vrsqrt.f32 %v819_v18 }
 0x68e   : > { %v1226_v19 = vpop.eup %1225 }
 0x68f   : > { %v821_v20 = vmul.f32 %v1226_v19, %v813_v7 }
 0x691   : > { %v822_v21 = vmul.f32 %v1040_v46, %v821_v20 }
 0x693   : > { %v823_v22 = vadd.f32 %v1041_v48, %v822_v21 }
 0x695   : > { %1128 = vmatmul.mubr.msk.f32.vlgmr.msra.gmra.mrb[4].mxu0 %vm462_vm2, %v823_v22 }
 0x768   : > { %v904_v23 = vpop.f32.mrb[4].mxu0 }
 0x769   : > { %v905_v24 = vadd.f32 %v1044_v3, %v904_v23  ;;  %v1129_v25 = vpop.f32.mrb[5].mxu0 }
 0x76b   : > { %908 = vst.msk [vmem:[%s415_s24] sm:$0xff] %vm442_vm1, %v905_v24 }
 0x76c   : > { %1240 = shalt.err (!%p1237_p5)
}
 0x76d   : > { %s1241_s12 = scalar_lea.hbm %s1521_s11, 128  ;;  %s1245_s29 = scalar_lea.hbm %s1579_s10, 256 }
 0x76e   : > { %p1242_p6 = scmp.ne.s32.totalorder %s1521_s11, %s1241_s12  ;;  %p1246_p10 = scmp.lt.u32.totalorder %s1521_s11, %s1579_s10 }
 0x76f   : > { %p1247_p11 = scmp.lt.u32.totalorder %s1245_s29, %s1241_s12  ;;  %p1249_p13 = scmp.lt.u32.totalorder %s1241_s12, %s1521_s11 }
 0x770   : > { %p1243_p7 = pnand %p1242_p6, %p1407_p4 }
 0x771   : > { %p1248_p12 = por %p1247_p11, %p1246_p10 }
 0x772   : > { %p1244_p9 = pneg %p1243_p7 }
 0x773   : > { %p1250_p0 = por %p1249_p13, %p1248_p12 }
 0x775   : > { %p1251_p1 = pnand %p1250_p0, %p1244_p9 }
 0x777   : > { %1254 = shalt.err (!%p1251_p1)
}
 0x778   : > { %1160 = dma.vmem_to_hbm [thread:$0]  (%p1407_p4), %s1523_s28, 128, %s1521_s11, %s910_s22  }
 0x779 PF: > { %p1166_p2 = scmp.ge.s32.totalorder %s1305_s18, 2  ;;  %s936_s0 = sand.u32 1, %s1285_s13  }
 0x77a   : > { %s937_s20 = scalar_lea.sflag [#allocation3], %s936_s0 }
 0x77b   : > { %p1163_p3 = pnand %p1166_p2, %p1414_p8 }
 0x77d   : > { %1280 = dma.done.wait (!%p1163_p3), %s937_s20, 128  }
 0x77e   : > { %1282 = vsyncadd (!%p1163_p3), %s937_s20, 4294967168  ;;  %s23_s18 = sadd.s32 1, %s1305_s18   ;;  %s1584_s13 = smov %s1289_s14 }
 0x77f   : > { %p20_p5 = scmp.ge.s32.totalorder %s23_s18, 4   ;;  %s1585_s14 = smov %s1293_s15 }
 0x780   : > { %s1586_s15 = smov %s1420_s26  ;;  %s1587_s16 = smov %s1301_s17 }
 0x781   : > { %s1588_s17 = smov %s1590_s21  ;;  %22 = sbr.rel (!%p20_p5) target bundleno = 6 (0x6), region = 104 }
 0x788   :  { %942 = vsyncpa [#allocation3], 1 }
 0x789   :  { %944 = vsyncpa [#allocation3 + $0x1], 1 }

</bundles_post_ra>
